<compile_context>
chip_gen: v7x
topology: tpu7x:2x2x1
jax: 0.10.0
libtpu: 0.0.40
codegen_flags: <defaults>
</compile_context>

<pallas_src>
import functools

import jax
import jax.numpy as jnp
from jax.experimental import pallas as pl
from jax.experimental.pallas import tpu as pltpu


def _lstm_kernel(x_ref, h0_ref, c0_ref, wih_ref, whh_ref, b_ref,
                 wdec_ref, bdec_ref, out_ref, *, seq_len, b_pad, b_valid, hs):
    # ---- hoisted, time-parallel input projection (one bf16 MXU pass for all steps) ----
    # x_ref: (S*B_pad, inp) bf16, wih_ref: (inp, 4*hs) bf16, b_ref: (1, 4*hs) f32.
    # g-gate columns of wih/b were pre-scaled by 2 (tanh-via-sigmoid identity).
    xproj = jnp.dot(x_ref[...], wih_ref[...],
                    preferred_element_type=jnp.float32) + b_ref[...]   # (S*B_pad, 4*hs) f32

    whh = whh_ref[...]                          # (hs, 4*hs) bf16, loop-invariant MXU RHS
    h = h0_ref[...]                             # (B_pad, hs) f32
    c = c0_ref[...]                             # (B_pad, hs) f32

    # ---- recurrence, statically unrolled (S is small & static) ----
    for t in range(seq_len):
        # (8, 128)-aligned static slice of the precomputed input projection.
        g_x = xproj[t * b_pad:(t + 1) * b_pad, :]
        gates = g_x + jnp.dot(h.astype(jnp.bfloat16), whh,
                              preferred_element_type=jnp.float32)       # (B_pad, 4*hs) f32

        # Single EUP pass over the whole 128-lane gates vreg; the g-gate was
        # pre-scaled by 2, so tanh(g) = 2*sigmoid(2g) - 1 comes from the same
        # sigmoid with one extra VPU mul+sub.
        sig = jax.nn.sigmoid(gates)
        i_g = sig[:, 0 * hs:1 * hs]
        f_g = sig[:, 1 * hs:2 * hs]
        g_g = 2.0 * sig[:, 2 * hs:3 * hs] - 1.0
        o_g = sig[:, 3 * hs:4 * hs]

        c = f_g * c + i_g * g_g
        h = o_g * jnp.tanh(c)                   # second (and last) EUP pass per step

    # ---- decoder + softmax over dim=0 (batch axis), excluding padded rows ----
    logits = jnp.dot(h, wdec_ref[...],
                     preferred_element_type=jnp.float32) + bdec_ref[...]   # (B_pad, 128)
    row_ids = jax.lax.broadcasted_iota(jnp.int32, logits.shape, 0)
    valid = row_ids < b_valid
    masked = jnp.where(valid, logits, jnp.full_like(logits, -jnp.inf))
    m = jnp.max(masked, axis=0, keepdims=True)
    e = jnp.where(valid, jnp.exp(logits - m), jnp.zeros_like(logits))
    denom = jnp.sum(e, axis=0, keepdims=True)
    out_ref[...] = (e / denom).astype(out_ref.dtype)


def prepare_params(params):
    """One-time weight preprocessing, hoisted off the per-call forward path."""
    four_hs, _ = params["w_ih"].shape
    hs = four_hs // 4
    n_dec = params["w_dec"].shape[0]            # 4
    n_pad = 128                                 # lane-dense decoder output

    # tanh(x) = 2*sigmoid(2x) - 1: pre-scale the g-gate pre-activation columns by 2
    # so the kernel needs only one transcendental pass over the gates per step.
    g_scale = jnp.ones((1, 4 * hs), jnp.float32).at[:, 2 * hs:3 * hs].set(2.0)

    wih_t = (params["w_ih"].T.astype(jnp.float32) * g_scale).astype(jnp.bfloat16)
    whh_t = (params["w_hh"].T.astype(jnp.float32) * g_scale).astype(jnp.bfloat16)
    b = (params["b_ih"] + params["b_hh"]).reshape(1, 4 * hs).astype(jnp.float32) * g_scale
    wdec_t = jnp.zeros((hs, n_pad), jnp.float32).at[:, :n_dec].set(params["w_dec"].T)
    bdec = jnp.zeros((1, n_pad), jnp.float32).at[:, :n_dec].set(params["b_dec"])
    return {"wih_t": wih_t, "whh_t": whh_t, "b": b, "wdec_t": wdec_t, "bdec": bdec}


def my_lstm_forward(x, h0, c0, prep):
    """x: (S, B, inp); h0, c0: (B, hs); returns (B, 4) = softmax(dim=0)(Linear(h_S))."""
    S, B, inp = x.shape
    hs = h0.shape[-1]
    n_dec = 4
    B_pad = ((B + 7) // 8) * 8                  # pad batch to sublane width
    N_pad = prep["wdec_t"].shape[-1]            # 128

    # Per-call prep: pad batch, flatten time for the hoisted projection, bf16 for MXU.
    x_p = jnp.pad(x.astype(jnp.float32), ((0, 0), (0, B_pad - B), (0, 0)))
    x_p = x_p.reshape(S * B_pad, inp).astype(jnp.bfloat16)
    h0_p = jnp.pad(h0.astype(jnp.float32), ((0, B_pad - B), (0, 0)))
    c0_p = jnp.pad(c0.astype(jnp.float32), ((0, B_pad - B), (0, 0)))

    kernel = functools.partial(_lstm_kernel, seq_len=S, b_pad=B_pad, b_valid=B, hs=hs)
    vmem = pl.BlockSpec(memory_space=pltpu.MemorySpace.VMEM)

    out = pl.pallas_call(
        kernel,
        out_shape=jax.ShapeDtypeStruct((B_pad, N_pad), jnp.float32),
        in_specs=[vmem] * 8,
        out_specs=vmem,
        compiler_params=pltpu.CompilerParams(vmem_limit_bytes=2 * 1024 * 1024),
    )(x_p, h0_p, c0_p, prep["wih_t"], prep["whh_t"], prep["b"],
      prep["wdec_t"], prep["bdec"])

    return out[:B, :n_dec].astype(x.dtype)


def _reference_forward(x, h0, c0, params):
    """Pure-JAX f32 reference mirroring the PyTorch module."""
    h, c = h0, c0
    hs = h0.shape[-1]
    for t in range(x.shape[0]):
        gates = (x[t] @ params["w_ih"].T + params["b_ih"]
                 + h @ params["w_hh"].T + params["b_hh"])
        i = jax.nn.sigmoid(gates[:, 0 * hs:1 * hs])
        f = jax.nn.sigmoid(gates[:, 1 * hs:2 * hs])
        g = jnp.tanh(gates[:, 2 * hs:3 * hs])
        o = jax.nn.sigmoid(gates[:, 3 * hs:4 * hs])
        c = f * c + i * g
        h = o * jnp.tanh(c)
    logits = h @ params["w_dec"].T + params["b_dec"]
    return jax.nn.softmax(logits, axis=0)


def _init_params(key, input_size, hidden_size):
    """Deterministic init matching PyTorch LSTMCell/Linear uniform(-1/sqrt(hs), 1/sqrt(hs))."""
    ks = jax.random.split(key, 6)
    bound = 1.0 / jnp.sqrt(hidden_size)
    u = lambda k, shape, b: jax.random.uniform(k, shape, jnp.float32, -b, b)
    return {
        "w_ih": u(ks[0], (4 * hidden_size, input_size), bound),
        "w_hh": u(ks[1], (4 * hidden_size, hidden_size), bound),
        "b_ih": u(ks[2], (4 * hidden_size,), bound),
        "b_hh": u(ks[3], (4 * hidden_size,), bound),
        "w_dec": u(ks[4], (4, hidden_size), bound),
        "b_dec": u(ks[5], (4,), bound),
    }


if __name__ == "__main__":
    seq_len, batch, input_size, hidden_size = 8, 4, 16, 32

    key = jax.random.PRNGKey(0)
    k_x, k_p = jax.random.split(key)
    x = jax.random.normal(k_x, (seq_len, batch, input_size), jnp.float32)
    h0 = jnp.zeros((batch, hidden_size), jnp.float32)   # init_hidden()
    c0 = jnp.zeros((batch, hidden_size), jnp.float32)
    params = _init_params(k_p, input_size, hidden_size)

    prep = prepare_params(params)                        # one-time, off the hot path
    prep = jax.tree_util.tree_map(jax.block_until_ready, prep)

    fwd = jax.jit(my_lstm_forward)                       # fuses padding around the custom call
    out = jax.block_until_ready(fwd(x, h0, c0, prep))

    ref = _reference_forward(x, h0, c0, params)
    assert out.shape == (batch, 4)
    # bf16 MXU operands inside the recurrence -> slightly relaxed tolerance vs f32 reference.
    assert jnp.allclose(out, ref, atol=2e-3), "mismatch vs pure-JAX reference"

    print("KERNEL_OK")
</pallas_src>

<mosaic_0001>
module attributes {stable_mosaic.version = 11 : i64} {
  func.func @_lstm_kernel(%arg0: memref<64x16xbf16, #tpu.memory_space<vmem>>, %arg1: memref<8x32xf32, #tpu.memory_space<vmem>>, %arg2: memref<8x32xf32, #tpu.memory_space<vmem>>, %arg3: memref<16x128xbf16, #tpu.memory_space<vmem>>, %arg4: memref<32x128xbf16, #tpu.memory_space<vmem>>, %arg5: memref<1x128xf32, #tpu.memory_space<vmem>>, %arg6: memref<32x128xf32, #tpu.memory_space<vmem>>, %arg7: memref<1x128xf32, #tpu.memory_space<vmem>>, %arg8: memref<8x128xf32, #tpu.memory_space<vmem>>) attributes {dimension_semantics = [], scalar_prefetch = 0 : i64, scratch_operands = 0 : i64, tpu.core_type = #tpu.core_type<tc>} {
    %c0 = arith.constant 0 : index
    %c0_0 = arith.constant 0 : index
    %0 = vector.load %arg0[%c0, %c0_0] : memref<64x16xbf16, #tpu.memory_space<vmem>>, vector<64x16xbf16>
    %c0_1 = arith.constant 0 : index
    %c0_2 = arith.constant 0 : index
    %1 = vector.load %arg3[%c0_1, %c0_2] : memref<16x128xbf16, #tpu.memory_space<vmem>>, vector<16x128xbf16>
    %cst = arith.constant dense<0.000000e+00> : vector<64x128xf32>
    %2 = tpu.matmul %0, %1, %cst {dimension_numbers = #tpu.dot_dimension_numbers<[1], [0], [0], [1], [0, 0, 1, 1], [], []>} : vector<64x16xbf16>, vector<16x128xbf16>, vector<64x128xf32> -> vector<64x128xf32>
    %c0_3 = arith.constant 0 : index
    %c0_4 = arith.constant 0 : index
    %3 = vector.load %arg5[%c0_3, %c0_4] : memref<1x128xf32, #tpu.memory_space<vmem>>, vector<1x128xf32>
    %4 = vector.broadcast %3 : vector<1x128xf32> to vector<64x128xf32>
    %5 = arith.addf %2, %4 : vector<64x128xf32>
    %c0_5 = arith.constant 0 : index
    %c0_6 = arith.constant 0 : index
    %6 = vector.load %arg4[%c0_5, %c0_6] : memref<32x128xbf16, #tpu.memory_space<vmem>>, vector<32x128xbf16>
    %c0_7 = arith.constant 0 : index
    %c0_8 = arith.constant 0 : index
    %7 = vector.load %arg1[%c0_7, %c0_8] : memref<8x32xf32, #tpu.memory_space<vmem>>, vector<8x32xf32>
    %c0_9 = arith.constant 0 : index
    %c0_10 = arith.constant 0 : index
    %8 = vector.load %arg2[%c0_9, %c0_10] : memref<8x32xf32, #tpu.memory_space<vmem>>, vector<8x32xf32>
    %9 = vector.extract_strided_slice %5 {offsets = [0, 0], sizes = [8, 128], strides = [1, 1]} : vector<64x128xf32> to vector<8x128xf32>
    %10 = arith.truncf %7 : vector<8x32xf32> to vector<8x32xbf16>
    %cst_11 = arith.constant dense<0.000000e+00> : vector<8x128xf32>
    %11 = tpu.matmul %10, %6, %cst_11 {dimension_numbers = #tpu.dot_dimension_numbers<[1], [0], [0], [1], [0, 0, 1, 1], [], []>} : vector<8x32xbf16>, vector<32x128xbf16>, vector<8x128xf32> -> vector<8x128xf32>
    %12 = arith.addf %9, %11 : vector<8x128xf32>
    %13 = arith.negf %12 : vector<8x128xf32>
    %14 = math.exp %13 : vector<8x128xf32>
    %cst_12 = arith.constant 1.000000e+00 : f32
    %15 = vector.broadcast %cst_12 : f32 to vector<8x128xf32>
    %16 = arith.addf %15, %14 : vector<8x128xf32>
    %17 = arith.divf %15, %16 : vector<8x128xf32>
    %18 = vector.extract_strided_slice %17 {offsets = [0, 0], sizes = [8, 32], strides = [1, 1]} : vector<8x128xf32> to vector<8x32xf32>
    %19 = vector.extract_strided_slice %17 {offsets = [0, 32], sizes = [8, 32], strides = [1, 1]} : vector<8x128xf32> to vector<8x32xf32>
    %20 = vector.extract_strided_slice %17 {offsets = [0, 64], sizes = [8, 32], strides = [1, 1]} : vector<8x128xf32> to vector<8x32xf32>
    %cst_13 = arith.constant 2.000000e+00 : f32
    %21 = vector.broadcast %cst_13 : f32 to vector<8x32xf32>
    %22 = arith.mulf %21, %20 : vector<8x32xf32>
    %cst_14 = arith.constant 1.000000e+00 : f32
    %23 = vector.broadcast %cst_14 : f32 to vector<8x32xf32>
    %24 = arith.subf %22, %23 : vector<8x32xf32>
    %25 = vector.extract_strided_slice %17 {offsets = [0, 96], sizes = [8, 32], strides = [1, 1]} : vector<8x128xf32> to vector<8x32xf32>
    %26 = arith.mulf %19, %8 : vector<8x32xf32>
    %27 = arith.mulf %18, %24 : vector<8x32xf32>
    %28 = arith.addf %26, %27 : vector<8x32xf32>
    %29 = math.tanh %28 : vector<8x32xf32>
    %30 = arith.mulf %25, %29 : vector<8x32xf32>
    %31 = vector.extract_strided_slice %5 {offsets = [8, 0], sizes = [8, 128], strides = [1, 1]} : vector<64x128xf32> to vector<8x128xf32>
    %32 = arith.truncf %30 : vector<8x32xf32> to vector<8x32xbf16>
    %cst_15 = arith.constant dense<0.000000e+00> : vector<8x128xf32>
    %33 = tpu.matmul %32, %6, %cst_15 {dimension_numbers = #tpu.dot_dimension_numbers<[1], [0], [0], [1], [0, 0, 1, 1], [], []>} : vector<8x32xbf16>, vector<32x128xbf16>, vector<8x128xf32> -> vector<8x128xf32>
    %34 = arith.addf %31, %33 : vector<8x128xf32>
    %35 = arith.negf %34 : vector<8x128xf32>
    %36 = math.exp %35 : vector<8x128xf32>
    %cst_16 = arith.constant 1.000000e+00 : f32
    %37 = vector.broadcast %cst_16 : f32 to vector<8x128xf32>
    %38 = arith.addf %37, %36 : vector<8x128xf32>
    %39 = arith.divf %37, %38 : vector<8x128xf32>
    %40 = vector.extract_strided_slice %39 {offsets = [0, 0], sizes = [8, 32], strides = [1, 1]} : vector<8x128xf32> to vector<8x32xf32>
    %41 = vector.extract_strided_slice %39 {offsets = [0, 32], sizes = [8, 32], strides = [1, 1]} : vector<8x128xf32> to vector<8x32xf32>
    %42 = vector.extract_strided_slice %39 {offsets = [0, 64], sizes = [8, 32], strides = [1, 1]} : vector<8x128xf32> to vector<8x32xf32>
    %cst_17 = arith.constant 2.000000e+00 : f32
    %43 = vector.broadcast %cst_17 : f32 to vector<8x32xf32>
    %44 = arith.mulf %43, %42 : vector<8x32xf32>
    %cst_18 = arith.constant 1.000000e+00 : f32
    %45 = vector.broadcast %cst_18 : f32 to vector<8x32xf32>
    %46 = arith.subf %44, %45 : vector<8x32xf32>
    %47 = vector.extract_strided_slice %39 {offsets = [0, 96], sizes = [8, 32], strides = [1, 1]} : vector<8x128xf32> to vector<8x32xf32>
    %48 = arith.mulf %41, %28 : vector<8x32xf32>
    %49 = arith.mulf %40, %46 : vector<8x32xf32>
    %50 = arith.addf %48, %49 : vector<8x32xf32>
    %51 = math.tanh %50 : vector<8x32xf32>
    %52 = arith.mulf %47, %51 : vector<8x32xf32>
    %53 = vector.extract_strided_slice %5 {offsets = [16, 0], sizes = [8, 128], strides = [1, 1]} : vector<64x128xf32> to vector<8x128xf32>
    %54 = arith.truncf %52 : vector<8x32xf32> to vector<8x32xbf16>
    %cst_19 = arith.constant dense<0.000000e+00> : vector<8x128xf32>
    %55 = tpu.matmul %54, %6, %cst_19 {dimension_numbers = #tpu.dot_dimension_numbers<[1], [0], [0], [1], [0, 0, 1, 1], [], []>} : vector<8x32xbf16>, vector<32x128xbf16>, vector<8x128xf32> -> vector<8x128xf32>
    %56 = arith.addf %53, %55 : vector<8x128xf32>
    %57 = arith.negf %56 : vector<8x128xf32>
    %58 = math.exp %57 : vector<8x128xf32>
    %cst_20 = arith.constant 1.000000e+00 : f32
    %59 = vector.broadcast %cst_20 : f32 to vector<8x128xf32>
    %60 = arith.addf %59, %58 : vector<8x128xf32>
    %61 = arith.divf %59, %60 : vector<8x128xf32>
    %62 = vector.extract_strided_slice %61 {offsets = [0, 0], sizes = [8, 32], strides = [1, 1]} : vector<8x128xf32> to vector<8x32xf32>
    %63 = vector.extract_strided_slice %61 {offsets = [0, 32], sizes = [8, 32], strides = [1, 1]} : vector<8x128xf32> to vector<8x32xf32>
    %64 = vector.extract_strided_slice %61 {offsets = [0, 64], sizes = [8, 32], strides = [1, 1]} : vector<8x128xf32> to vector<8x32xf32>
    %cst_21 = arith.constant 2.000000e+00 : f32
    %65 = vector.broadcast %cst_21 : f32 to vector<8x32xf32>
    %66 = arith.mulf %65, %64 : vector<8x32xf32>
    %cst_22 = arith.constant 1.000000e+00 : f32
    %67 = vector.broadcast %cst_22 : f32 to vector<8x32xf32>
    %68 = arith.subf %66, %67 : vector<8x32xf32>
    %69 = vector.extract_strided_slice %61 {offsets = [0, 96], sizes = [8, 32], strides = [1, 1]} : vector<8x128xf32> to vector<8x32xf32>
    %70 = arith.mulf %63, %50 : vector<8x32xf32>
    %71 = arith.mulf %62, %68 : vector<8x32xf32>
    %72 = arith.addf %70, %71 : vector<8x32xf32>
    %73 = math.tanh %72 : vector<8x32xf32>
    %74 = arith.mulf %69, %73 : vector<8x32xf32>
    %75 = vector.extract_strided_slice %5 {offsets = [24, 0], sizes = [8, 128], strides = [1, 1]} : vector<64x128xf32> to vector<8x128xf32>
    %76 = arith.truncf %74 : vector<8x32xf32> to vector<8x32xbf16>
    %cst_23 = arith.constant dense<0.000000e+00> : vector<8x128xf32>
    %77 = tpu.matmul %76, %6, %cst_23 {dimension_numbers = #tpu.dot_dimension_numbers<[1], [0], [0], [1], [0, 0, 1, 1], [], []>} : vector<8x32xbf16>, vector<32x128xbf16>, vector<8x128xf32> -> vector<8x128xf32>
    %78 = arith.addf %75, %77 : vector<8x128xf32>
    %79 = arith.negf %78 : vector<8x128xf32>
    %80 = math.exp %79 : vector<8x128xf32>
    %cst_24 = arith.constant 1.000000e+00 : f32
    %81 = vector.broadcast %cst_24 : f32 to vector<8x128xf32>
    %82 = arith.addf %81, %80 : vector<8x128xf32>
    %83 = arith.divf %81, %82 : vector<8x128xf32>
    %84 = vector.extract_strided_slice %83 {offsets = [0, 0], sizes = [8, 32], strides = [1, 1]} : vector<8x128xf32> to vector<8x32xf32>
    %85 = vector.extract_strided_slice %83 {offsets = [0, 32], sizes = [8, 32], strides = [1, 1]} : vector<8x128xf32> to vector<8x32xf32>
    %86 = vector.extract_strided_slice %83 {offsets = [0, 64], sizes = [8, 32], strides = [1, 1]} : vector<8x128xf32> to vector<8x32xf32>
    %cst_25 = arith.constant 2.000000e+00 : f32
    %87 = vector.broadcast %cst_25 : f32 to vector<8x32xf32>
    %88 = arith.mulf %87, %86 : vector<8x32xf32>
    %cst_26 = arith.constant 1.000000e+00 : f32
    %89 = vector.broadcast %cst_26 : f32 to vector<8x32xf32>
    %90 = arith.subf %88, %89 : vector<8x32xf32>
    %91 = vector.extract_strided_slice %83 {offsets = [0, 96], sizes = [8, 32], strides = [1, 1]} : vector<8x128xf32> to vector<8x32xf32>
    %92 = arith.mulf %85, %72 : vector<8x32xf32>
    %93 = arith.mulf %84, %90 : vector<8x32xf32>
    %94 = arith.addf %92, %93 : vector<8x32xf32>
    %95 = math.tanh %94 : vector<8x32xf32>
    %96 = arith.mulf %91, %95 : vector<8x32xf32>
    %97 = vector.extract_strided_slice %5 {offsets = [32, 0], sizes = [8, 128], strides = [1, 1]} : vector<64x128xf32> to vector<8x128xf32>
    %98 = arith.truncf %96 : vector<8x32xf32> to vector<8x32xbf16>
    %cst_27 = arith.constant dense<0.000000e+00> : vector<8x128xf32>
    %99 = tpu.matmul %98, %6, %cst_27 {dimension_numbers = #tpu.dot_dimension_numbers<[1], [0], [0], [1], [0, 0, 1, 1], [], []>} : vector<8x32xbf16>, vector<32x128xbf16>, vector<8x128xf32> -> vector<8x128xf32>
    %100 = arith.addf %97, %99 : vector<8x128xf32>
    %101 = arith.negf %100 : vector<8x128xf32>
    %102 = math.exp %101 : vector<8x128xf32>
    %cst_28 = arith.constant 1.000000e+00 : f32
    %103 = vector.broadcast %cst_28 : f32 to vector<8x128xf32>
    %104 = arith.addf %103, %102 : vector<8x128xf32>
    %105 = arith.divf %103, %104 : vector<8x128xf32>
    %106 = vector.extract_strided_slice %105 {offsets = [0, 0], sizes = [8, 32], strides = [1, 1]} : vector<8x128xf32> to vector<8x32xf32>
    %107 = vector.extract_strided_slice %105 {offsets = [0, 32], sizes = [8, 32], strides = [1, 1]} : vector<8x128xf32> to vector<8x32xf32>
    %108 = vector.extract_strided_slice %105 {offsets = [0, 64], sizes = [8, 32], strides = [1, 1]} : vector<8x128xf32> to vector<8x32xf32>
    %cst_29 = arith.constant 2.000000e+00 : f32
    %109 = vector.broadcast %cst_29 : f32 to vector<8x32xf32>
    %110 = arith.mulf %109, %108 : vector<8x32xf32>
    %cst_30 = arith.constant 1.000000e+00 : f32
    %111 = vector.broadcast %cst_30 : f32 to vector<8x32xf32>
    %112 = arith.subf %110, %111 : vector<8x32xf32>
    %113 = vector.extract_strided_slice %105 {offsets = [0, 96], sizes = [8, 32], strides = [1, 1]} : vector<8x128xf32> to vector<8x32xf32>
    %114 = arith.mulf %107, %94 : vector<8x32xf32>
    %115 = arith.mulf %106, %112 : vector<8x32xf32>
    %116 = arith.addf %114, %115 : vector<8x32xf32>
    %117 = math.tanh %116 : vector<8x32xf32>
    %118 = arith.mulf %113, %117 : vector<8x32xf32>
    %119 = vector.extract_strided_slice %5 {offsets = [40, 0], sizes = [8, 128], strides = [1, 1]} : vector<64x128xf32> to vector<8x128xf32>
    %120 = arith.truncf %118 : vector<8x32xf32> to vector<8x32xbf16>
    %cst_31 = arith.constant dense<0.000000e+00> : vector<8x128xf32>
    %121 = tpu.matmul %120, %6, %cst_31 {dimension_numbers = #tpu.dot_dimension_numbers<[1], [0], [0], [1], [0, 0, 1, 1], [], []>} : vector<8x32xbf16>, vector<32x128xbf16>, vector<8x128xf32> -> vector<8x128xf32>
    %122 = arith.addf %119, %121 : vector<8x128xf32>
    %123 = arith.negf %122 : vector<8x128xf32>
    %124 = math.exp %123 : vector<8x128xf32>
    %cst_32 = arith.constant 1.000000e+00 : f32
    %125 = vector.broadcast %cst_32 : f32 to vector<8x128xf32>
    %126 = arith.addf %125, %124 : vector<8x128xf32>
    %127 = arith.divf %125, %126 : vector<8x128xf32>
    %128 = vector.extract_strided_slice %127 {offsets = [0, 0], sizes = [8, 32], strides = [1, 1]} : vector<8x128xf32> to vector<8x32xf32>
    %129 = vector.extract_strided_slice %127 {offsets = [0, 32], sizes = [8, 32], strides = [1, 1]} : vector<8x128xf32> to vector<8x32xf32>
    %130 = vector.extract_strided_slice %127 {offsets = [0, 64], sizes = [8, 32], strides = [1, 1]} : vector<8x128xf32> to vector<8x32xf32>
    %cst_33 = arith.constant 2.000000e+00 : f32
    %131 = vector.broadcast %cst_33 : f32 to vector<8x32xf32>
    %132 = arith.mulf %131, %130 : vector<8x32xf32>
    %cst_34 = arith.constant 1.000000e+00 : f32
    %133 = vector.broadcast %cst_34 : f32 to vector<8x32xf32>
    %134 = arith.subf %132, %133 : vector<8x32xf32>
    %135 = vector.extract_strided_slice %127 {offsets = [0, 96], sizes = [8, 32], strides = [1, 1]} : vector<8x128xf32> to vector<8x32xf32>
    %136 = arith.mulf %129, %116 : vector<8x32xf32>
    %137 = arith.mulf %128, %134 : vector<8x32xf32>
    %138 = arith.addf %136, %137 : vector<8x32xf32>
    %139 = math.tanh %138 : vector<8x32xf32>
    %140 = arith.mulf %135, %139 : vector<8x32xf32>
    %141 = vector.extract_strided_slice %5 {offsets = [48, 0], sizes = [8, 128], strides = [1, 1]} : vector<64x128xf32> to vector<8x128xf32>
    %142 = arith.truncf %140 : vector<8x32xf32> to vector<8x32xbf16>
    %cst_35 = arith.constant dense<0.000000e+00> : vector<8x128xf32>
    %143 = tpu.matmul %142, %6, %cst_35 {dimension_numbers = #tpu.dot_dimension_numbers<[1], [0], [0], [1], [0, 0, 1, 1], [], []>} : vector<8x32xbf16>, vector<32x128xbf16>, vector<8x128xf32> -> vector<8x128xf32>
    %144 = arith.addf %141, %143 : vector<8x128xf32>
    %145 = arith.negf %144 : vector<8x128xf32>
    %146 = math.exp %145 : vector<8x128xf32>
    %cst_36 = arith.constant 1.000000e+00 : f32
    %147 = vector.broadcast %cst_36 : f32 to vector<8x128xf32>
    %148 = arith.addf %147, %146 : vector<8x128xf32>
    %149 = arith.divf %147, %148 : vector<8x128xf32>
    %150 = vector.extract_strided_slice %149 {offsets = [0, 0], sizes = [8, 32], strides = [1, 1]} : vector<8x128xf32> to vector<8x32xf32>
    %151 = vector.extract_strided_slice %149 {offsets = [0, 32], sizes = [8, 32], strides = [1, 1]} : vector<8x128xf32> to vector<8x32xf32>
    %152 = vector.extract_strided_slice %149 {offsets = [0, 64], sizes = [8, 32], strides = [1, 1]} : vector<8x128xf32> to vector<8x32xf32>
    %cst_37 = arith.constant 2.000000e+00 : f32
    %153 = vector.broadcast %cst_37 : f32 to vector<8x32xf32>
    %154 = arith.mulf %153, %152 : vector<8x32xf32>
    %cst_38 = arith.constant 1.000000e+00 : f32
    %155 = vector.broadcast %cst_38 : f32 to vector<8x32xf32>
    %156 = arith.subf %154, %155 : vector<8x32xf32>
    %157 = vector.extract_strided_slice %149 {offsets = [0, 96], sizes = [8, 32], strides = [1, 1]} : vector<8x128xf32> to vector<8x32xf32>
    %158 = arith.mulf %151, %138 : vector<8x32xf32>
    %159 = arith.mulf %150, %156 : vector<8x32xf32>
    %160 = arith.addf %158, %159 : vector<8x32xf32>
    %161 = math.tanh %160 : vector<8x32xf32>
    %162 = arith.mulf %157, %161 : vector<8x32xf32>
    %163 = vector.extract_strided_slice %5 {offsets = [56, 0], sizes = [8, 128], strides = [1, 1]} : vector<64x128xf32> to vector<8x128xf32>
    %164 = arith.truncf %162 : vector<8x32xf32> to vector<8x32xbf16>
    %cst_39 = arith.constant dense<0.000000e+00> : vector<8x128xf32>
    %165 = tpu.matmul %164, %6, %cst_39 {dimension_numbers = #tpu.dot_dimension_numbers<[1], [0], [0], [1], [0, 0, 1, 1], [], []>} : vector<8x32xbf16>, vector<32x128xbf16>, vector<8x128xf32> -> vector<8x128xf32>
    %166 = arith.addf %163, %165 : vector<8x128xf32>
    %167 = arith.negf %166 : vector<8x128xf32>
    %168 = math.exp %167 : vector<8x128xf32>
    %cst_40 = arith.constant 1.000000e+00 : f32
    %169 = vector.broadcast %cst_40 : f32 to vector<8x128xf32>
    %170 = arith.addf %169, %168 : vector<8x128xf32>
    %171 = arith.divf %169, %170 : vector<8x128xf32>
    %172 = vector.extract_strided_slice %171 {offsets = [0, 0], sizes = [8, 32], strides = [1, 1]} : vector<8x128xf32> to vector<8x32xf32>
    %173 = vector.extract_strided_slice %171 {offsets = [0, 32], sizes = [8, 32], strides = [1, 1]} : vector<8x128xf32> to vector<8x32xf32>
    %174 = vector.extract_strided_slice %171 {offsets = [0, 64], sizes = [8, 32], strides = [1, 1]} : vector<8x128xf32> to vector<8x32xf32>
    %cst_41 = arith.constant 2.000000e+00 : f32
    %175 = vector.broadcast %cst_41 : f32 to vector<8x32xf32>
    %176 = arith.mulf %175, %174 : vector<8x32xf32>
    %cst_42 = arith.constant 1.000000e+00 : f32
    %177 = vector.broadcast %cst_42 : f32 to vector<8x32xf32>
    %178 = arith.subf %176, %177 : vector<8x32xf32>
    %179 = vector.extract_strided_slice %171 {offsets = [0, 96], sizes = [8, 32], strides = [1, 1]} : vector<8x128xf32> to vector<8x32xf32>
    %180 = arith.mulf %173, %160 : vector<8x32xf32>
    %181 = arith.mulf %172, %178 : vector<8x32xf32>
    %182 = arith.addf %180, %181 : vector<8x32xf32>
    %183 = math.tanh %182 : vector<8x32xf32>
    %184 = arith.mulf %179, %183 : vector<8x32xf32>
    %c0_43 = arith.constant 0 : index
    %c0_44 = arith.constant 0 : index
    %185 = vector.load %arg6[%c0_43, %c0_44] : memref<32x128xf32, #tpu.memory_space<vmem>>, vector<32x128xf32>
    %cst_45 = arith.constant dense<0.000000e+00> : vector<8x128xf32>
    %186 = tpu.matmul %184, %185, %cst_45 {dimension_numbers = #tpu.dot_dimension_numbers<[1], [0], [0], [1], [0, 0, 1, 1], [], []>} : vector<8x32xf32>, vector<32x128xf32>, vector<8x128xf32> -> vector<8x128xf32>
    %c0_46 = arith.constant 0 : index
    %c0_47 = arith.constant 0 : index
    %187 = vector.load %arg7[%c0_46, %c0_47] : memref<1x128xf32, #tpu.memory_space<vmem>>, vector<1x128xf32>
    %188 = vector.broadcast %187 : vector<1x128xf32> to vector<8x128xf32>
    %189 = arith.addf %186, %188 : vector<8x128xf32>
    %190 = tpu.iota {dimensions = array<i32: 0>} : vector<8x128xi32>
    %c4_i32 = arith.constant 4 : i32
    %191 = vector.broadcast %c4_i32 : i32 to vector<8x128xi32>
    %192 = arith.cmpi slt, %190, %191 : vector<8x128xi32>
    %cst_48 = arith.constant 0xFF800000 : f32
    %193 = vector.broadcast %cst_48 : f32 to vector<8x128xf32>
    %194 = arith.select %192, %189, %193 : vector<8x128xi1>, vector<8x128xf32>
    %cst_49 = arith.constant dense<0xFF800000> : vector<128xf32>
    %195 = vector.multi_reduction <maximumf>, %194, %cst_49 [0] : vector<8x128xf32> to vector<128xf32>
    %196 = vector.shape_cast %195 : vector<128xf32> to vector<1x128xf32>
    %197 = vector.broadcast %196 : vector<1x128xf32> to vector<8x128xf32>
    %198 = arith.subf %189, %197 : vector<8x128xf32>
    %199 = math.exp %198 : vector<8x128xf32>
    %cst_50 = arith.constant 0.000000e+00 : f32
    %200 = vector.broadcast %cst_50 : f32 to vector<8x128xf32>
    %201 = arith.select %192, %199, %200 : vector<8x128xi1>, vector<8x128xf32>
    %cst_51 = arith.constant dense<0.000000e+00> : vector<128xf32>
    %202 = vector.multi_reduction <add>, %201, %cst_51 [0] : vector<8x128xf32> to vector<128xf32>
    %203 = vector.shape_cast %202 : vector<128xf32> to vector<1x128xf32>
    %204 = vector.broadcast %203 : vector<1x128xf32> to vector<8x128xf32>
    %205 = arith.divf %201, %204 : vector<8x128xf32>
    %c0_52 = arith.constant 0 : index
    %c0_53 = arith.constant 0 : index
    %206 = vector.load %arg8[%c0_52, %c0_53] : memref<8x128xf32, #tpu.memory_space<vmem>>, vector<8x128xf32>
    tpu.vector_store %arg8[%c0_52, %c0_53], %205 {strides = array<i32>} : memref<8x128xf32, #tpu.memory_space<vmem>>, vector<8x128xf32>,
    return
  }
}

</mosaic_0001>

<bundles_post_ra>
// kernel: my_lstm_forward.1
= control target key start
LH: loop header
LB: loop body
LE: loop exit
PB: predicated region body
PF: predicated region fallthrough
CT: control target
= control target key end

     0   :  { %v1095_v0 = vmov 0.0   ;;  %vm1096_vm0 = vmmov 0   ;;  %vm73_vm1 = vcmask 130048   ;;  %vm170_vm2 = vcmask 261120   ;;  %s1098_s18 = smov 32   ;;  %s1321_s3 = inlined_call_operand.vmem [shape: bf16[16,128], index: 3, kind: input, shape index: {}]   ;;  %s1322_s4 = inlined_call_operand.vmem [shape: bf16[32,128], index: 4, kind: input, shape index: {}]   ;;  %s1323_s0 = inlined_call_operand.vmem [shape: bf16[64,16], index: 0, kind: input, shape index: {}]   ;;  %s1324_s1 = inlined_call_operand.vmem [shape: f32[8,32], index: 1, kind: input, shape index: {}]   ;;  %s1325_s5 = inlined_call_operand.vmem [shape: f32[1,128], index: 5, kind: input, shape index: {}]   ;;  %s1326_s2 = inlined_call_operand.vmem [shape: f32[8,32], index: 2, kind: input, shape index: {}]   ;;  %s1327_s6 = inlined_call_operand.vmem [shape: f32[32,128], index: 6, kind: input, shape index: {}]   ;;  %s1328_s7 = inlined_call_operand.vmem [shape: f32[1,128], index: 7, kind: input, shape index: {}]   ;;  %s1329_s8 = inlined_call_operand.vmem [shape: f32[8,128], index: 8, kind: output, shape index: {}]  }
   0x1   :  { %950 = vmatprep.subr.bf16.mxu1 %v1095_v0  ;;  %v1036_v1 = vld [vmem:[%s1321_s3] sm:$0xff]   ;;  %954 = vmatprep.mubr.msk.bf16.mxu1 %vm1096_vm0, %v1095_v0  ;;  %v1039_v4 = vld [vmem:[%s1323_s0 + $0x8] sm:$0xff]   ;;  %v1041_v54 = vld [vmem:[%s1323_s0 + $0x10] sm:$0xff]  }
   0x2   :  { %v1154_v2 = vld [vmem:[%s1322_s4] sm:$0xff]   ;;  %940 = vmatprep.subr.bf16.mxu0 %v1036_v1  ;;  %v1168_v5 = vld [vmem:[%s1322_s4 + $0x8] sm:$0xff]   ;;  %v1042_v55 = vld [vmem:[%s1323_s0 + $0x18] sm:$0xff]  }
   0x3   :  { %v1038_v3 = vld [vmem:[%s1323_s0] sm:$0xff]   ;;  %951 = vmatpush3.bf16.msra.mxu1 %v1154_v2  ;;  %941 = vmatpush3.bf16.msra.mxu0 %v1036_v1 }
   0x4   :  { %942 = vmatprep.mubr.msk.bf16.mxu0 %vm73_vm1, %v1038_v3  ;;  %952 = vmatprep.subr.bf16.mxu1 %v1095_v0  ;;  %v155_v6 = vld [vmem:[%s1324_s1] sm:$0xff] }
   0x5   :  { %966 = vmatprep.subr.bf16.mxu0 %v1095_v0  ;;  %v157_v7 = vpack.c.bf16 %v155_v6, %v155_v6  ;;  %v1191_v8 = vld [vmem:[%s1325_s5] ss:$0 sm:$0xff]  ;;  %s1097_s5 = smov 64  }
   0x6   :  { %943 = vmatmul.mubr.msk.bf16.vlgmr.msra.gmra.mrb[0].mxu0 %vm73_vm1, %v1039_v4  ;;  %v156_v25 = vld [vmem:[%s1326_s2] sm:$0xff] }
   0x7   :  { %953 = vmatpush3.bf16.msra.mxu1 %v1168_v5  ;;  %967 = vmatpush3.bf16.msra.mxu0 %v1154_v2 }
   0x8   :  { %958 = vmatprep.subr.bf16.mxu1 %v1095_v0  ;;  %968 = vmatprep.subr.bf16.mxu0 %v1095_v0 }
   0x9   :  { %946 = vmatprep.mubr.msk.bf16.mxu0 %vm73_vm1, %v1041_v54 }
   0xa   :  { %955 = vmatmul.mubr.msk.bf16.vlgmr.msra.gmra.mrb[0].mxu1 %vm170_vm2, %v157_v7 }
   0xb   :  { %959 = vmatpush3.bf16.msra.mxu1 %v1154_v2  ;;  %962 = vmatprep.mubr.msk.bf16.mxu1 %vm1096_vm0, %v1095_v0 }
   0xc   :  { %960 = vmatprep.subr.bf16.mxu1 %v1095_v0  ;;  %969 = vmatpush3.bf16.msra.mxu0 %v1168_v5 }
   0xd   :  { %982 = vmatprep.subr.bf16.mxu0 %v1095_v0 }
   0xe   :  { %947 = vmatmul.mubr.msk.bf16.gmra.mrb[4].mxu0 %vm73_vm1, %v1042_v55 }
   0xf   :  { %961 = vmatpush3.bf16.msra.mxu1 %v1168_v5  ;;  %970 = vmatprep.mubr.msk.bf16.mxu0 %vm1096_vm0, %v1095_v0 }
  0x10   :  { %974 = vmatprep.subr.bf16.mxu1 %v1095_v0 }
  0xd9   :  { %v1193_v9 = vpop.f32.mrb[0].mxu0 }
  0xda   :  { %v120_v10 = vpop.f32.mrb[1].mxu0  ;;  %v129_v3 = vadd.f32 %v1193_v9, %v1191_v8 }
  0xdb   :  { %v121_v11 = vadd.f32 %v1191_v8, %v120_v10  ;;  %v1196_v12 = vpop.f32.mrb[2].mxu0 }
  0xdc   :  { %v123_v13 = vpop.f32.mrb[3].mxu0 }
  0xdd   :  { %v208_v14 = vpop.f32.mrb[0].mxu1  ;;  %v124_v37 = vadd.f32 %v1191_v8, %v123_v13 }
  0xde   :  { %v214_v15 = vadd.f32 %v208_v14, %v121_v11  ;;  %v956_v16 = vpop.f32.mrb[1].mxu1 }
  0xdf   :  { %v211_v17 = vpop.f32.mrb[2].mxu1 }
  0xe0   :  { %v881_v18 = vmul.f32 -1.442695, %v214_v15  ;;  %v957_v19 = vpop.f32.mrb[3].mxu1 }
  0xe1   :  { %v1228_v60 = vpop.f32.mrb[4].mxu0 }
  0xe2   :  { %1043 = vpow2.f32 %v881_v18  ;;  %v1230_v61 = vpop.f32.mrb[5].mxu0 }
  0xe3   :  { %v1232_v62 = vpop.f32.mrb[6].mxu0 }
  0xe4   :  { %v1234_v63 = vpop.f32.mrb[7].mxu0 }
  0xec   :  { %v1044_v20 = vpop.eup %1043 }
  0xed   :  { %v218_v21 = vadd.f32 1.0, %v1044_v20 }
  0xef   :  { %1045 = vrcp.f32 %v218_v21 }
  0xf9   :  { %v1046_v22 = vpop.eup %1045 }
  0xfa   :  { %v221_v23 = vmul.f32 2.0, %v1046_v22 }
  0xfc   :  { %v882_v24 = vadd.f32 -1.0, %v221_v23 }
  0xfe   :  { %229 = vrot.lane.b32.xlu0 %v882_v24, %s1097_s5 }
 0x102   :  { %224 = vrot.lane.b32.xlu0 %v156_v25, %s1098_s18 }
 0x170   :  { %v230_v26 = vpop.permute.xlu0 %229 }
 0x171   :  { %v232_v27 = vmul.f32 %v1046_v22, %v230_v26 }
 0x173   :  { %234 = vrot.lane.b32.xlu1 %v232_v27, %s1098_s18 }
 0x174   :  { %v225_v28 = vpop.permute.xlu0 %224 }
 0x175   :  { %v227_v29 = vmul.f32 %v1046_v22, %v225_v28  ;;  %v132_v28 = vadd.f32 %v1196_v12, %v1191_v8 }
 0x1e5   :  { %v235_v30 = vpop.permute.xlu1 %234 }
 0x1e6   :  { %v237_v31 = vadd.f32 %v235_v30, %v227_v29 }
 0x1e8   :  { %1047 = vtanh.f32 %v237_v31 }
 0x1f2   :  { %v1048_v32 = vpop.eup %1047 }
 0x1f3   :  { %240 = vrot.lane.b32.xlu1 %v1048_v32, %s1097_s5 }
 0x265   :  { %v241_v33 = vpop.permute.xlu1 %240 }
 0x266   :  { %v243_v34 = vmul.f32 %v1046_v22, %v241_v33 }
 0x268   :  { %v244_v35 = vpack.c.bf16 %v243_v34, %v243_v34 }
 0x26a   :  { %246 = vrot.lane.b32.xlu0 %v244_v35, %s1098_s18 }
 0x2dc   :  { %v247_v36 = vpop.permute.xlu0 %246 }
 0x2dd   :  { %963 = vmatmul.mubr.msk.bf16.vlgmr.msra.gmra.mrb[4].mxu1 %vm170_vm2, %v247_v36 }
 0x2de   :  { %975 = vmatpush3.bf16.msra.mxu1 %v1154_v2  ;;  %978 = vmatprep.mubr.msk.bf16.mxu1 %vm1096_vm0, %v1095_v0 }
 0x2df   :  { %976 = vmatprep.subr.bf16.mxu1 %v1095_v0 }
 0x2e2   :  { %977 = vmatpush3.bf16.msra.mxu1 %v1168_v5 }
 0x2e3   :  { %990 = vmatprep.subr.bf16.mxu1 %v1095_v0 }
 0x3b0   :  { %v285_v38 = vpop.f32.mrb[4].mxu1 }
 0x3b1   :  { %v291_v39 = vadd.f32 %v285_v38, %v124_v37  ;;  %v964_v40 = vpop.f32.mrb[5].mxu1 }
 0x3b2   :  { %v288_v41 = vpop.f32.mrb[6].mxu1 }
 0x3b3   :  { %v884_v42 = vmul.f32 -1.442695, %v291_v39  ;;  %v965_v43 = vpop.f32.mrb[7].mxu1 }
 0x3b5   :  { %1049 = vpow2.f32 %v884_v42 }
 0x3bf   :  { %v1050_v44 = vpop.eup %1049 }
 0x3c0   :  { %v295_v45 = vadd.f32 1.0, %v1050_v44 }
 0x3c2   :  { %1051 = vrcp.f32 %v295_v45 }
 0x3cc   :  { %v1052_v46 = vpop.eup %1051 }
 0x3cd   :  { %v298_v47 = vmul.f32 2.0, %v1052_v46  ;;  %v300_v51 = vmul.f32 %v1052_v46, %v237_v31 }
 0x3cf   :  { %v885_v48 = vadd.f32 -1.0, %v298_v47 }
 0x3d1   :  { %302 = vrot.lane.b32.xlu1 %v885_v48, %s1097_s5 }
 0x443   :  { %v303_v49 = vpop.permute.xlu1 %302 }
 0x444   :  { %v305_v50 = vmul.f32 %v1052_v46, %v303_v49  ;;  %v137_v49 = vadd.f32 %v1191_v8, %v1230_v61 }
 0x446   :  { %307 = vrot.lane.b32.xlu0 %v305_v50, %s1098_s18 }
 0x4b8   :  { %v308_v52 = vpop.permute.xlu0 %307 }
 0x4b9   :  { %v310_v53 = vadd.f32 %v308_v52, %v300_v51 }
 0x4bb   :  { %1053 = vtanh.f32 %v310_v53 }
 0x4c5   :  { %v1054_v56 = vpop.eup %1053 }
 0x4c6   :  { %313 = vrot.lane.b32.xlu1 %v1054_v56, %s1097_s5 }
 0x538   :  { %v314_v57 = vpop.permute.xlu1 %313 }
 0x539   :  { %v316_v58 = vmul.f32 %v1052_v46, %v314_v57 }
 0x53b   :  { %v317_v59 = vpack.c.bf16 %v316_v58, %v316_v58 }
 0x53d   :  { %319 = vrot.lane.b32.xlu0 %v317_v59, %s1098_s18 }
 0x5af   :  { %v320_v1 = vpop.permute.xlu0 %319 }
 0x5b0   :  { %971 = vmatmul.mubr.msk.bf16.vlgmr.msra.gmra.mrb[8].mxu0 %vm170_vm2, %v320_v1 }
 0x5b1   :  { %983 = vmatpush3.bf16.msra.mxu0 %v1154_v2  ;;  %986 = vmatprep.mubr.msk.bf16.mxu0 %vm1096_vm0, %v1095_v0 }
 0x5b2   :  { %984 = vmatprep.subr.bf16.mxu0 %v1095_v0 }
 0x5b5   :  { %985 = vmatpush3.bf16.msra.mxu0 %v1168_v5 }
 0x5b6   :  { %998 = vmatprep.subr.bf16.mxu0 %v1095_v0 }
 0x683   :  { %v358_v4 = vpop.f32.mrb[8].mxu0 }
 0x684   :  { %v364_v6 = vadd.f32 %v358_v4, %v129_v3  ;;  %v972_v7 = vpop.f32.mrb[9].mxu0 }
 0x685   :  { %v361_v10 = vpop.f32.mrb[10].mxu0 }
 0x686   :  { %v887_v11 = vmul.f32 -1.442695, %v364_v6  ;;  %v973_v13 = vpop.f32.mrb[11].mxu0 }
 0x688   :  { %1055 = vpow2.f32 %v887_v11 }
 0x692   :  { %v1056_v14 = vpop.eup %1055 }
 0x693   :  { %v368_v15 = vadd.f32 1.0, %v1056_v14 }
 0x695   :  { %1057 = vrcp.f32 %v368_v15 }
 0x69f   :  { %v1058_v16 = vpop.eup %1057 }
 0x6a0   :  { %v371_v17 = vmul.f32 2.0, %v1058_v16  ;;  %v373_v9 = vmul.f32 %v1058_v16, %v310_v53 }
 0x6a2   :  { %v888_v18 = vadd.f32 -1.0, %v371_v17 }
 0x6a4   :  { %375 = vrot.lane.b32.xlu1 %v888_v18, %s1097_s5 }
 0x716   :  { %v376_v19 = vpop.permute.xlu1 %375 }
 0x717   :  { %v378_v20 = vmul.f32 %v1058_v16, %v376_v19 }
 0x719   :  { %380 = vrot.lane.b32.xlu0 %v378_v20, %s1098_s18 }
 0x78b   :  { %v381_v21 = vpop.permute.xlu0 %380 }
 0x78c   :  { %v383_v22 = vadd.f32 %v381_v21, %v373_v9 }
 0x78e   :  { %1059 = vtanh.f32 %v383_v22 }
 0x798   :  { %v1060_v23 = vpop.eup %1059 }
 0x799   :  { %386 = vrot.lane.b32.xlu1 %v1060_v23, %s1097_s5 }
 0x80b   :  { %v387_v24 = vpop.permute.xlu1 %386 }
 0x80c   :  { %v389_v25 = vmul.f32 %v1058_v16, %v387_v24  ;;  %v140_v16 = vadd.f32 %v1191_v8, %v1234_v63 }
 0x80e   :  { %v390_v26 = vpack.c.bf16 %v389_v25, %v389_v25 }
 0x810   :  { %392 = vrot.lane.b32.xlu0 %v390_v26, %s1098_s18 }
 0x882   :  { %v393_v27 = vpop.permute.xlu0 %392 }
 0x883   :  { %979 = vmatmul.mubr.msk.bf16.vlgmr.msra.gmra.mrb[8].mxu1 %vm170_vm2, %v393_v27 }
 0x884   :  { %991 = vmatpush3.bf16.msra.mxu1 %v1154_v2  ;;  %994 = vmatprep.mubr.msk.bf16.mxu1 %vm1096_vm0, %v1095_v0 }
 0x885   :  { %992 = vmatprep.subr.bf16.mxu1 %v1095_v0 }
 0x888   :  { %993 = vmatpush3.bf16.msra.mxu1 %v1168_v5 }
 0x889   :  { %1006 = vmatprep.subr.bf16.mxu1 %v1095_v0 }
 0x956   :  { %v431_v29 = vpop.f32.mrb[8].mxu1 }
 0x957   :  { %v437_v30 = vadd.f32 %v431_v29, %v132_v28  ;;  %v980_v31 = vpop.f32.mrb[9].mxu1 }
 0x958   :  { %v434_v32 = vpop.f32.mrb[10].mxu1 }
 0x959   :  { %v890_v33 = vmul.f32 -1.442695, %v437_v30  ;;  %v981_v34 = vpop.f32.mrb[11].mxu1 }
 0x95a   :  { %v145_v34 = vadd.f32 %v1228_v60, %v1191_v8 }
 0x95b   :  { %1061 = vpow2.f32 %v890_v33 }
 0x965   :  { %v1062_v35 = vpop.eup %1061 }
 0x966   :  { %v441_v36 = vadd.f32 1.0, %v1062_v35 }
 0x968   :  { %1063 = vrcp.f32 %v441_v36 }
 0x972   :  { %v1064_v37 = vpop.eup %1063 }
 0x973   :  { %v444_v38 = vmul.f32 2.0, %v1064_v37  ;;  %v446_v12 = vmul.f32 %v1064_v37, %v383_v22 }
 0x975   :  { %v891_v39 = vadd.f32 -1.0, %v444_v38 }
 0x977   :  { %448 = vrot.lane.b32.xlu1 %v891_v39, %s1097_s5 }
 0x9e9   :  { %v449_v40 = vpop.permute.xlu1 %448 }
 0x9ea   :  { %v451_v41 = vmul.f32 %v1064_v37, %v449_v40 }
 0x9ec   :  { %453 = vrot.lane.b32.xlu0 %v451_v41, %s1098_s18 }
 0xa5e   :  { %v454_v42 = vpop.permute.xlu0 %453 }
 0xa5f   :  { %v456_v43 = vadd.f32 %v454_v42, %v446_v12 }
 0xa61   :  { %1065 = vtanh.f32 %v456_v43 }
 0xa6b   :  { %v1066_v44 = vpop.eup %1065 }
 0xa6c   :  { %459 = vrot.lane.b32.xlu1 %v1066_v44, %s1097_s5 }
 0xade   :  { %v460_v45 = vpop.permute.xlu1 %459 }
 0xadf   :  { %v462_v46 = vmul.f32 %v1064_v37, %v460_v45 }
 0xae1   :  { %v463_v47 = vpack.c.bf16 %v462_v46, %v462_v46 }
 0xae3   :  { %465 = vrot.lane.b32.xlu0 %v463_v47, %s1098_s18 }
 0xb55   :  { %v466_v48 = vpop.permute.xlu0 %465 }
 0xb56   :  { %987 = vmatmul.mubr.msk.bf16.vlgmr.msra.gmra.mrb[12].mxu0 %vm170_vm2, %v466_v48 }
 0xb57   :  { %999 = vmatpush3.bf16.msra.mxu0 %v1154_v2  ;;  %1002 = vmatprep.mubr.msk.bf16.mxu0 %vm1096_vm0, %v1095_v0 }
 0xb58   :  { %1000 = vmatprep.subr.bf16.mxu0 %v1095_v0 }
 0xb5b   :  { %1001 = vmatpush3.bf16.msra.mxu0 %v1168_v5 }
 0xc29   :  { %v504_v50 = vpop.f32.mrb[12].mxu0 }
 0xc2a   :  { %v510_v51 = vadd.f32 %v504_v50, %v137_v49  ;;  %v988_v52 = vpop.f32.mrb[13].mxu0 }
 0xc2b   :  { %v507_v53 = vpop.f32.mrb[14].mxu0 }
 0xc2c   :  { %v893_v54 = vmul.f32 -1.442695, %v510_v51  ;;  %v989_v55 = vpop.f32.mrb[15].mxu0  ;;  %v148_v53 = vadd.f32 %v1232_v62, %v1191_v8 }
 0xc2e   :  { %1067 = vpow2.f32 %v893_v54 }
 0xc38   :  { %v1068_v56 = vpop.eup %1067 }
 0xc39   :  { %v514_v57 = vadd.f32 1.0, %v1068_v56 }
 0xc3b   :  { %1069 = vrcp.f32 %v514_v57 }
 0xc45   :  { %v1070_v58 = vpop.eup %1069 }
 0xc46   :  { %v517_v59 = vmul.f32 2.0, %v1070_v58  ;;  %v519_v61 = vmul.f32 %v1070_v58, %v456_v43 }
 0xc48   :  { %v894_v1 = vadd.f32 -1.0, %v517_v59 }
 0xc4a   :  { %521 = vrot.lane.b32.xlu1 %v894_v1, %s1097_s5 }
 0xcbc   :  { %v522_v3 = vpop.permute.xlu1 %521 }
 0xcbd   :  { %v524_v4 = vmul.f32 %v1070_v58, %v522_v3 }
 0xcbf   :  { %526 = vrot.lane.b32.xlu0 %v524_v4, %s1098_s18 }
 0xd31   :  { %v527_v6 = vpop.permute.xlu0 %526 }
 0xd32   :  { %v529_v7 = vadd.f32 %v527_v6, %v519_v61 }
 0xd34   :  { %1071 = vtanh.f32 %v529_v7 }
 0xd3e   :  { %v1072_v10 = vpop.eup %1071 }
 0xd3f   :  { %532 = vrot.lane.b32.xlu1 %v1072_v10, %s1097_s5 }
 0xdb1   :  { %v533_v11 = vpop.permute.xlu1 %532 }
 0xdb2   :  { %v535_v13 = vmul.f32 %v1070_v58, %v533_v11 }
 0xdb4   :  { %v536_v14 = vpack.c.bf16 %v535_v13, %v535_v13  ;;  %v1099_v13 = vmov 0.0|0.0  }
 0xdb5   :  { %1025 = vmatprep.subr.bf16.mxu0 %v1099_v13 }
 0xdb6   :  { %538 = vrot.lane.b32.xlu0 %v536_v14, %s1098_s18  ;;  %v755_v14 = vld [vmem:[%s1327_s6] sm:$0xff] }
 0xe28   :  { %v539_v15 = vpop.permute.xlu0 %538 }
 0xe29   :  { %995 = vmatmul.mubr.msk.bf16.vlgmr.msra.gmra.mrb[12].mxu1 %vm170_vm2, %v539_v15  ;;  %v756_v15 = vld [vmem:[%s1327_s6 + $0x8] sm:$0xff] }
 0xe2a   :  { %1007 = vmatpush3.bf16.msra.mxu1 %v1154_v2  ;;  %1010 = vmatprep.mubr.msk.bf16.mxu1 %vm1096_vm0, %v1095_v0 }
 0xe2b   :  { %1008 = vmatprep.subr.bf16.mxu1 %v1095_v0 }
 0xe2e   :  { %1009 = vmatpush3.bf16.msra.mxu1 %v1168_v5 }
 0xefc   :  { %v577_v17 = vpop.f32.mrb[12].mxu1 }
 0xefd   :  { %v583_v18 = vadd.f32 %v577_v17, %v140_v16  ;;  %v996_v19 = vpop.f32.mrb[13].mxu1  ;;  %v757_v16 = vld [vmem:[%s1327_s6 + $0x10] sm:$0xff]  ;;  %v1026_v17 = vpack.c.bf16 %v756_v15, %v755_v14 }
 0xefe   :  { %v580_v20 = vpop.f32.mrb[14].mxu1 }
 0xeff   :  { %v896_v9 = vmul.f32 -1.442695, %v583_v18  ;;  %v997_v21 = vpop.f32.mrb[15].mxu1  ;;  %v758_v18 = vld [vmem:[%s1327_s6 + $0x18] sm:$0xff] }
 0xf00   :  { %v1029_v19 = vpack.c.bf16 %v758_v18, %v757_v16 }
 0xf01   :  { %1073 = vpow2.f32 %v896_v9 }
 0xf0b   :  { %v1074_v22 = vpop.eup %1073 }
 0xf0c   :  { %v587_v23 = vadd.f32 1.0, %v1074_v22 }
 0xf0e   :  { %1075 = vrcp.f32 %v587_v23  ;;  %v841_v23 = vlaneseq }
 0xf18   :  { %v1076_v2 = vpop.eup %1075 }
 0xf19   :  { %v590_v24 = vmul.f32 2.0, %v1076_v2  ;;  %v592_v63 = vmul.f32 %v1076_v2, %v529_v7 }
 0xf1b   :  { %v897_v25 = vadd.f32 -1.0, %v590_v24  ;;  %v904_v24 = vld [vmem:[%s1328_s7] ss:$0 sm:$0xff] }
 0xf1d   :  { %594 = vrot.lane.b32.xlu1 %v897_v25, %s1097_s5 }
 0xf8f   :  { %v595_v26 = vpop.permute.xlu1 %594 }
 0xf90   :  { %v597_v5 = vmul.f32 %v1076_v2, %v595_v26 }
 0xf92   :  { %599 = vrot.lane.b32.xlu0 %v597_v5, %s1098_s18 }
0x1004   :  { %v600_v27 = vpop.permute.xlu0 %599 }
0x1005   :  { %v602_v28 = vadd.f32 %v600_v27, %v592_v63 }
0x1007   :  { %1077 = vtanh.f32 %v602_v28 }
0x1011   :  { %v1078_v29 = vpop.eup %1077 }
0x1012   :  { %605 = vrot.lane.b32.xlu1 %v1078_v29, %s1097_s5 }
0x1084   :  { %v606_v30 = vpop.permute.xlu1 %605 }
0x1085   :  { %v608_v31 = vmul.f32 %v1076_v2, %v606_v30  ;;  %v842_v2 = vshrl.u32 %v841_v23, 7 }
0x1087   :  { %v609_v32 = vpack.c.bf16 %v608_v31, %v608_v31  ;;  %vm843_vm3 = vcmp.lt.s32.totalorder %v842_v2, 4 }
0x1089   :  { %611 = vrot.lane.b32.xlu0 %v609_v32, %s1098_s18 }
0x10fb   :  { %v612_v33 = vpop.permute.xlu0 %611 }
0x10fc   :  { %1003 = vmatmul.mubr.msk.bf16.vlgmr.msra.gmra.mrb[16].mxu0 %vm170_vm2, %v612_v33 }
0x10fd   :  { %1022 = vmatprep.mubr.msk.f32.mxu0 %vm1096_vm0, %v1095_v0  ;;  %1027 = vmatpush3.bf16.msra.mxu0 %v1026_v17 }
0x10fe   :  { %1028 = vmatprep.subr.bf16.mxu0 %v1099_v13 }
0x1101   :  { %1030 = vmatpush3.bf16.msra.mxu0 %v1029_v19 }
0x11cf   :  { %v650_v35 = vpop.f32.mrb[16].mxu0 }
0x11d0   :  { %v656_v36 = vadd.f32 %v650_v35, %v145_v34  ;;  %v1004_v37 = vpop.f32.mrb[17].mxu0 }
0x11d1   :  { %v653_v38 = vpop.f32.mrb[18].mxu0 }
0x11d2   :  { %v899_v39 = vmul.f32 -1.442695, %v656_v36  ;;  %v1005_v40 = vpop.f32.mrb[19].mxu0 }
0x11d4   :  { %1079 = vpow2.f32 %v899_v39 }
0x11de   :  { %v1080_v41 = vpop.eup %1079 }
0x11df   :  { %v660_v12 = vadd.f32 1.0, %v1080_v41 }
0x11e1   :  { %1081 = vrcp.f32 %v660_v12 }
0x11eb   :  { %v1082_v42 = vpop.eup %1081 }
0x11ec   :  { %v663_v43 = vmul.f32 2.0, %v1082_v42  ;;  %v665_v60 = vmul.f32 %v1082_v42, %v602_v28 }
0x11ee   :  { %v900_v44 = vadd.f32 -1.0, %v663_v43 }
0x11f0   :  { %667 = vrot.lane.b32.xlu1 %v900_v44, %s1097_s5 }
0x1262   :  { %v668_v45 = vpop.permute.xlu1 %667 }
0x1263   :  { %v670_v0 = vmul.f32 %v1082_v42, %v668_v45 }
0x1265   :  { %672 = vrot.lane.b32.xlu0 %v670_v0, %s1098_s18 }
0x12d7   :  { %v673_v46 = vpop.permute.xlu0 %672 }
0x12d8   :  { %v675_v47 = vadd.f32 %v673_v46, %v665_v60 }
0x12da   :  { %1083 = vtanh.f32 %v675_v47 }
0x12e4   :  { %v1084_v48 = vpop.eup %1083 }
0x12e5   :  { %678 = vrot.lane.b32.xlu1 %v1084_v48, %s1097_s5 }
0x1357   :  { %v679_v49 = vpop.permute.xlu1 %678 }
0x1358   :  { %v681_v50 = vmul.f32 %v1082_v42, %v679_v49 }
0x135a   :  { %v682_v51 = vpack.c.bf16 %v681_v50, %v681_v50 }
0x135c   :  { %684 = vrot.lane.b32.xlu0 %v682_v51, %s1098_s18 }
0x13ce   :  { %v685_v52 = vpop.permute.xlu0 %684 }
0x13cf   :  { %1011 = vmatmul.mubr.msk.bf16.vlgmr.msra.gmra.mrb[16].mxu1 %vm170_vm2, %v685_v52 }
0x14a2   :  { %v723_v54 = vpop.f32.mrb[16].mxu1 }
0x14a3   :  { %v729_v55 = vadd.f32 %v723_v54, %v148_v53  ;;  %v1012_v56 = vpop.f32.mrb[17].mxu1 }
0x14a4   :  { %v726_v57 = vpop.f32.mrb[18].mxu1 }
0x14a5   :  { %v902_v58 = vmul.f32 -1.442695, %v729_v55  ;;  %v1013_v59 = vpop.f32.mrb[19].mxu1 }
0x14a7   :  { %1085 = vpow2.f32 %v902_v58 }
0x14b1   :  { %v1086_v1 = vpop.eup %1085 }
0x14b2   :  { %v733_v3 = vadd.f32 1.0, %v1086_v1 }
0x14b4   :  { %1087 = vrcp.f32 %v733_v3 }
0x14be   :  { %v1088_v4 = vpop.eup %1087 }
0x14bf   :  { %v736_v61 = vmul.f32 2.0, %v1088_v4  ;;  %v738_v8 = vmul.f32 %v1088_v4, %v675_v47 }
0x14c1   :  { %v903_v6 = vadd.f32 -1.0, %v736_v61 }
0x14c3   :  { %740 = vrot.lane.b32.xlu1 %v903_v6, %s1097_s5 }
0x1535   :  { %v741_v7 = vpop.permute.xlu1 %740 }
0x1536   :  { %v743_v10 = vmul.f32 %v1088_v4, %v741_v7 }
0x1538   :  { %745 = vrot.lane.b32.xlu0 %v743_v10, %s1098_s18 }
0x15aa   :  { %v746_v62 = vpop.permute.xlu0 %745 }
0x15ab   :  { %v748_v11 = vadd.f32 %v746_v62, %v738_v8 }
0x15ad   :  { %1089 = vtanh.f32 %v748_v11 }
0x15b7   :  { %v1090_v20 = vpop.eup %1089 }
0x15b8   :  { %751 = vrot.lane.b32.xlu1 %v1090_v20, %s1097_s5 }
0x162a   :  { %v752_v9 = vpop.permute.xlu1 %751 }
0x162b   :  { %v754_v21 = vmul.f32 %v1088_v4, %v752_v9 }
0x162d   :  { %767 = vrot.lane.b32.xlu0 %v754_v21, %s1098_s18 }
0x169f   :  { %v768_v22 = vpop.permute.xlu0 %767 }
0x16a0   :  { %1023 = vmatmul.mubr.msk.f32.vlgmr.msra.gmra.mrb[20].mxu0 %vm170_vm2, %v768_v22 }
0x1773   :  { %v837_v25 = vpop.f32.mrb[20].mxu0 }
0x1774   :  { %v838_v26 = vadd.f32 %v904_v24, %v837_v25  ;;  %v1024_v5 = vpop.f32.mrb[21].mxu0 }
0x1776   :  { %v844_v63 = vsel %vm843_vm3, %v838_v26, -inf }
0x1777   :  { %v845_v27 = vrot.slane %v844_v63, 4 }
0x1779   :  { %v846_v28 = vmax.f32 %v844_v63, %v845_v27 }
0x177b   :  { %v847_v29 = vrot.slane %v846_v28, 2 }
0x177d   :  { %v848_v30 = vmax.f32 %v846_v28, %v847_v29 }
0x177f   :  { %v849_v31 = vrot.slane %v848_v30, 1 }
0x1781   :  { %v850_v32 = vmax.f32 %v848_v30, %v849_v31 }
0x1783   :  { %v851_v33 = vsub.f32 %v838_v26, %v850_v32 }
0x1785   :  { %v852_v34 = vmul.f32 1.442695, %v851_v33 }
0x1787   :  { %1091 = vpow2.f32 %v852_v34 }
0x1791   :  { %v1092_v35 = vpop.eup %1091 }
0x1792   :  { %v854_v36 = vsel %vm843_vm3, %v1092_v35, 0.0 }
0x1793   :  { %v855_v37 = vrot.slane %v854_v36, 4 }
0x1795   :  { %v856_v38 = vadd.f32 %v855_v37, %v854_v36 }
0x1797   :  { %v857_v39 = vrot.slane %v856_v38, 2 }
0x1799   :  { %v858_v40 = vadd.f32 %v857_v39, %v856_v38 }
0x179b   :  { %v859_v41 = vrot.slane %v858_v40, 1 }
0x179d   :  { %v860_v12 = vadd.f32 %v859_v41, %v858_v40 }
0x179f   :  { %1093 = vrcp.f32 %v860_v12 }
0x17a9   :  { %v1094_v42 = vpop.eup %1093 }
0x17aa   :  { %v862_v43 = vmul.f32 %v1094_v42, %v854_v36 }
0x17ac   :  { %863 = vst [vmem:[%s1329_s8] sm:$0xff] %v862_v43 }

</bundles_post_ra>
